<compile_context>
chip_gen: v7x
topology: tpu7x:2x2x1
jax: 0.10.0
libtpu: 0.0.40
codegen_flags: <defaults>
</compile_context>

<pallas_src>
import jax
import jax.numpy as jnp
import numpy as np
from jax.experimental import pallas as pl
from jax.experimental.pallas import tpu as pltpu


# ---------------------------------------------------------------------------
# Kernel
# ---------------------------------------------------------------------------

def _make_kernel(hw: int, tq: int, lhs_resident: bool):
    inv_hw = 1.0 / float(hw)

    def kernel(s_i_ref, t_i_ref, s_jt_ref, t_jt_ref, out_ref, acc_ref):
        q = pl.program_id(2)
        nq = pl.num_programs(2)

        # Reset the per-(i, j) accumulator at the first q step of this pair.
        @pl.when(q == 0)
        def _():
            acc_ref[...] = jnp.zeros_like(acc_ref)

        # LHS rows for this q tile.  1/T is already folded in (wrapper).
        if lhs_resident:
            row0 = pl.multiple_of(q * tq, tq)
            s_i = s_i_ref[pl.ds(row0, tq), :]      # (TQ, C) bf16
            t_i = t_i_ref[pl.ds(row0, tq), :]
        else:
            s_i = s_i_ref[...]                     # (TQ, C) bf16
            t_i = t_i_ref[...]

        # (TQ, C) x (C, HW) -> (TQ, HW); bf16 operands, f32 MXU accumulation.
        s_sim = jnp.dot(s_i, s_jt_ref[...], preferred_element_type=jnp.float32)
        t_sim = jnp.dot(t_i, t_jt_ref[...], preferred_element_type=jnp.float32)

        # Row-stable shifts (rows are complete, no online softmax needed).
        s_shift = s_sim - jnp.max(s_sim, axis=1, keepdims=True)
        t_shift = t_sim - jnp.max(t_sim, axis=1, keepdims=True)

        # Algebraic KL: never materialize log_p_s / p_t / log_p_t.
        #   kl_row = sum(t_exp*(t_shift - s_shift))/t_sum + log(s_sum) - log(t_sum)
        s_sum = jnp.sum(jnp.exp(s_shift), axis=1, keepdims=True)      # (TQ, 1)
        t_exp = jnp.exp(t_shift)                                      # (TQ, HW)
        t_sum = jnp.sum(t_exp, axis=1, keepdims=True)                 # (TQ, 1)
        row_dot = jnp.sum(t_exp * (t_shift - s_shift), axis=1, keepdims=True)

        kl_rows = row_dot / t_sum + jnp.log(s_sum) - jnp.log(t_sum)   # (TQ, 1)

        # F.kl_div(log_p_s, p_t, reduction='batchmean') partial for this tile.
        acc_ref[...] += jnp.sum(kl_rows, keepdims=True) * inv_hw

        # Write the per-(i, j) partial once, at the last q step of this pair.
        @pl.when(q == nq - 1)
        def _():
            out_ref[...] = jnp.broadcast_to(acc_ref[...], out_ref.shape)

    return kernel


# ---------------------------------------------------------------------------
# Config selection (VMEM-budget driven)
# ---------------------------------------------------------------------------

def _vmem_capacity_bytes():
    try:
        info = pltpu.get_tpu_info()
        cap = getattr(info, "vmem_capacity_bytes", None)
        if cap:
            return int(cap)
    except Exception:
        pass
    return 64 * 1024 * 1024  # conservative (v7x-sized) fallback


def _row_tile_candidates(hw, cap=1024):
    """Multiple-of-8 divisors of hw (descending), plus hw itself if small."""
    cands = [t for t in range(8, min(hw, cap) + 1, 8) if hw % t == 0]
    if hw <= cap:
        cands.append(hw)
    if not cands:
        # TODO(synk): very large HW with no multiple-of-8 divisor needs a
        # padded / Element-based tiling path; fall back to a full block.
        cands = [hw]
    return sorted(set(cands), reverse=True)


def _footprint_bytes(tq, c, hw, lhs_resident, rhs_buf):
    """Heuristic VMEM footprint for one configuration."""
    rhs = 2 * rhs_buf * c * hw * 2                                    # bf16 RHS
    lhs = (2 * 2 * hw * c * 2) if lhs_resident else (2 * 2 * tq * c * 2)
    temps = 5 * tq * hw * 4                                           # f32 temps
    return rhs + lhs + temps + (1 << 20)


def _choose_config(c, hw, vmem_limit):
    """Pick (TQ, lhs_resident, rhs_buffer_count) fitting the VMEM budget."""
    cands = _row_tile_candidates(hw)
    for lhs_resident in (True, False):          # prefer resident LHS (less HBM)
        for tq in cands:                        # prefer larger TQ (fewer steps)
            nq = hw // tq if hw % tq == 0 else 1
            for rhs_buf in ((3, 2) if nq >= 3 else (2,)):
                if _footprint_bytes(tq, c, hw, lhs_resident, rhs_buf) <= vmem_limit:
                    return tq, lhs_resident, rhs_buf
    # Nothing fits the heuristic budget: smallest tile, streamed LHS, 2 buffers.
    # TODO(synk): K-tile / single-buffer the (C, HW) RHS for very large C.
    return cands[-1], False, 2


# ---------------------------------------------------------------------------
# Wrapper
# ---------------------------------------------------------------------------

def _pool_and_normalize(feat, pooling):
    """AdaptiveAvgPool2d((pooling, pooling)) + F.normalize(p=2, dim=1), NCHW."""
    B, C, H, W = feat.shape
    if pooling is not None:
        # TODO(synk): general (non-divisible) adaptive-pool bins; uniform-window case only.
        assert H % pooling == 0 and W % pooling == 0
        feat = feat.reshape(B, C, pooling, H // pooling, pooling, W // pooling)
        feat = feat.mean(axis=(3, 5))
    norm = jnp.sqrt(jnp.sum(feat * feat, axis=1, keepdims=True))
    return feat / jnp.maximum(norm, 1e-12)


def criterion_minibatch_cross_image_pair(feat_S, feat_T, temperature=0.7,
                                         pooling=56):
    """feat_S, feat_T: NCHW float32 (like the PyTorch module). Returns scalar."""
    feat_S = _pool_and_normalize(feat_S.astype(jnp.float32), pooling)
    feat_T = _pool_and_normalize(feat_T.astype(jnp.float32), pooling)
    B, C, H, W = feat_S.shape
    HW = H * W

    vmem_cap = _vmem_capacity_bytes()
    vmem_limit = min(int(vmem_cap * 0.8), 100 * 1024 * 1024)
    TQ, lhs_resident, rhs_buf = _choose_config(int(C), int(HW), vmem_limit)

    # bf16 MXU operands; all accumulation + softmax/KL math stays f32 in-kernel.
    # 1/T is folded into the i-side operands here (fuses into the transpose +
    # cast XLA op), so the similarity maps come out of the MXU already scaled.
    inv_t = jnp.float32(1.0 / float(temperature))
    s_ct = feat_S.reshape(B, C, HW).astype(jnp.bfloat16)              # j-side
    t_ct = feat_T.reshape(B, C, HW).astype(jnp.bfloat16)
    s_tc = (jnp.transpose(feat_S.reshape(B, C, HW), (0, 2, 1)) * inv_t
            ).astype(jnp.bfloat16)                                     # i-side
    t_tc = (jnp.transpose(feat_T.reshape(B, C, HW), (0, 2, 1)) * inv_t
            ).astype(jnp.bfloat16)

    kernel = _make_kernel(int(HW), int(TQ), lhs_resident)

    if lhs_resident:
        # Full (HW, C) LHS slab resident per i; sliced along q inside the kernel.
        spec_i = pl.BlockSpec((None, HW, C), lambda i, j, q: (i, 0, 0))
    else:
        spec_i = pl.BlockSpec((None, TQ, C), lambda i, j, q: (i, q, 0))

    if rhs_buf > 2:
        spec_j = pl.BlockSpec((None, C, HW), lambda i, j, q: (j, 0, 0),
                              pipeline_mode=pl.Buffered(rhs_buf))
    else:
        spec_j = pl.BlockSpec((None, C, HW), lambda i, j, q: (j, 0, 0))

    out = pl.pallas_call(
        kernel,
        out_shape=jax.ShapeDtypeStruct((B, B, 8, 128), jnp.float32),
        grid_spec=pltpu.PrefetchScalarGridSpec(
            num_scalar_prefetch=0,
            grid=(B, B, HW // TQ),
            in_specs=[spec_i, spec_i, spec_j, spec_j],
            out_specs=pl.BlockSpec((None, None, 8, 128),
                                   lambda i, j, q: (i, j, 0, 0)),
            scratch_shapes=[pltpu.VMEM((1, 1), jnp.float32)]),
        compiler_params=pltpu.CompilerParams(
            dimension_semantics=("parallel", "parallel", "arbitrary"),
            vmem_limit_bytes=vmem_limit),
    )(s_tc, t_tc, s_ct, t_ct)

    return jnp.sum(out[:, :, 0, 0]) / (B * B)


# ---------------------------------------------------------------------------
# Pure-JAX reference + self-test
# ---------------------------------------------------------------------------

def _reference(feat_S, feat_T, temperature, pooling):
    """Pure-JAX f32 reference mirroring the PyTorch forward."""
    feat_S = _pool_and_normalize(feat_S.astype(jnp.float32), pooling)
    feat_T = _pool_and_normalize(feat_T.astype(jnp.float32), pooling)
    B, C, H, W = feat_S.shape
    HW = H * W
    s = jnp.transpose(feat_S.reshape(B, C, HW), (0, 2, 1))
    t = jnp.transpose(feat_T.reshape(B, C, HW), (0, 2, 1))
    total = jnp.float32(0.0)
    for i in range(B):
        for j in range(B):
            s_sim = (s[i] @ s[j].T) / temperature
            t_sim = (t[i] @ t[j].T) / temperature
            log_p_s = jax.nn.log_softmax(s_sim, axis=1)
            p_t = jax.nn.softmax(t_sim, axis=1)
            log_p_t = jax.nn.log_softmax(t_sim, axis=1)
            total = total + jnp.sum(p_t * (log_p_t - log_p_s)) / HW
    return total / (B * B)


if __name__ == "__main__":
    key = jax.random.PRNGKey(0)
    k1, k2 = jax.random.split(key)

    B, C, H, W = 2, 4, 16, 16
    pooling = 8          # small-shape analogue of the default pooling=56
    temperature = 0.7

    feat_S = jax.random.normal(k1, (B, C, H, W), dtype=jnp.float32)
    feat_T = jax.random.normal(k2, (B, C, H, W), dtype=jnp.float32)

    loss = criterion_minibatch_cross_image_pair(
        feat_S, feat_T, temperature=temperature, pooling=pooling)
    loss = jax.block_until_ready(loss)

    ref = jax.block_until_ready(_reference(feat_S, feat_T, temperature, pooling))

    # bf16 matmul operands (f32 accumulation, f32 softmax/KL) vs f32 reference.
    assert np.allclose(np.asarray(loss), np.asarray(ref),
                       rtol=5e-2, atol=5e-3), (loss, ref)

    print("KERNEL_OK")
</pallas_src>

<mosaic_0001>
module attributes {stable_mosaic.version = 11 : i64} {
  func.func @kernel(%arg0: i32, %arg1: i32, %arg2: i32, %arg3: memref<1x64x4xbf16, #tpu.memory_space<vmem>>, %arg4: memref<1x64x4xbf16, #tpu.memory_space<vmem>>, %arg5: memref<1x4x64xbf16, #tpu.memory_space<vmem>>, %arg6: memref<1x4x64xbf16, #tpu.memory_space<vmem>>, %arg7: memref<1x1x8x128xf32, #tpu.memory_space<vmem>>, %arg8: memref<1x1xf32, #tpu.memory_space<vmem>>) attributes {dimension_semantics = [#tpu.dimension_semantics<parallel>, #tpu.dimension_semantics<parallel>, #tpu.dimension_semantics<arbitrary>], iteration_bounds = array<i64: 2, 2, 1>, scalar_prefetch = 0 : i64, scratch_operands = 1 : i64, tpu.core_type = #tpu.core_type<tc>, window_params = [{transform_indices = @transform_0, window_bounds = array<i64: 1, 64, 4>}, {transform_indices = @transform_1, window_bounds = array<i64: 1, 64, 4>}, {transform_indices = @transform_2, window_bounds = array<i64: 1, 4, 64>}, {transform_indices = @transform_3, window_bounds = array<i64: 1, 4, 64>}, {transform_indices = @transform_4, window_bounds = array<i64: 1, 1, 8, 128>}]} {
    %c0_i32 = arith.constant 0 : i32
    %0 = arith.cmpi eq, %arg2, %c0_i32 : i32
    %1 = arith.extui %0 : i1 to i32
    %c0_i32_0 = arith.constant 0 : i32
    %2 = arith.cmpi ne, %1, %c0_i32_0 : i32
    scf.if %2 {
      %cst_24 = arith.constant 0.000000e+00 : f32
      %53 = vector.broadcast %cst_24 : f32 to vector<1x1xf32>
      %c0_25 = arith.constant 0 : index
      %c0_26 = arith.constant 0 : index
      %54 = vector.load %arg8[%c0_25, %c0_26] : memref<1x1xf32, #tpu.memory_space<vmem>>, vector<1x1xf32>
      tpu.vector_store %arg8[%c0_25, %c0_26], %53 {strides = array<i32>} : memref<1x1xf32, #tpu.memory_space<vmem>>, vector<1x1xf32>,
    } else {
    }
    %c64_i32 = arith.constant 64 : i32
    %3 = arith.muli %arg2, %c64_i32 : i32
    %4 = tpu.assume_multiple %3, 64 : i32
    %c0 = arith.constant 0 : index
    %5 = arith.index_cast %4 : i32 to index
    %c0_1 = arith.constant 0 : index
    %6 = vector.load %arg3[%c0, %5, %c0_1] : memref<1x64x4xbf16, #tpu.memory_space<vmem>>, vector<1x64x4xbf16>
    %7 = vector.shape_cast %6 : vector<1x64x4xbf16> to vector<64x4xbf16>
    %c0_2 = arith.constant 0 : index
    %8 = arith.index_cast %4 : i32 to index
    %c0_3 = arith.constant 0 : index
    %9 = vector.load %arg4[%c0_2, %8, %c0_3] : memref<1x64x4xbf16, #tpu.memory_space<vmem>>, vector<1x64x4xbf16>
    %10 = vector.shape_cast %9 : vector<1x64x4xbf16> to vector<64x4xbf16>
    %c0_4 = arith.constant 0 : index
    %c0_5 = arith.constant 0 : index
    %c0_6 = arith.constant 0 : index
    %11 = vector.load %arg5[%c0_4, %c0_5, %c0_6] : memref<1x4x64xbf16, #tpu.memory_space<vmem>>, vector<1x4x64xbf16>
    %12 = vector.shape_cast %11 : vector<1x4x64xbf16> to vector<4x64xbf16>
    %cst = arith.constant dense<0.000000e+00> : vector<64x64xf32>
    %13 = tpu.matmul %7, %12, %cst {dimension_numbers = #tpu.dot_dimension_numbers<[1], [0], [0], [1], [0, 0, 1, 1], [], []>} : vector<64x4xbf16>, vector<4x64xbf16>, vector<64x64xf32> -> vector<64x64xf32>
    %c0_7 = arith.constant 0 : index
    %c0_8 = arith.constant 0 : index
    %c0_9 = arith.constant 0 : index
    %14 = vector.load %arg6[%c0_7, %c0_8, %c0_9] : memref<1x4x64xbf16, #tpu.memory_space<vmem>>, vector<1x4x64xbf16>
    %15 = vector.shape_cast %14 : vector<1x4x64xbf16> to vector<4x64xbf16>
    %cst_10 = arith.constant dense<0.000000e+00> : vector<64x64xf32>
    %16 = tpu.matmul %10, %15, %cst_10 {dimension_numbers = #tpu.dot_dimension_numbers<[1], [0], [0], [1], [0, 0, 1, 1], [], []>} : vector<64x4xbf16>, vector<4x64xbf16>, vector<64x64xf32> -> vector<64x64xf32>
    %cst_11 = arith.constant dense<0xFF800000> : vector<64xf32>
    %17 = vector.multi_reduction <maximumf>, %13, %cst_11 [1] : vector<64x64xf32> to vector<64xf32>
    %18 = vector.shape_cast %17 : vector<64xf32> to vector<64x1xf32>
    %19 = vector.broadcast %18 : vector<64x1xf32> to vector<64x64xf32>
    %20 = arith.subf %13, %19 : vector<64x64xf32>
    %cst_12 = arith.constant dense<0xFF800000> : vector<64xf32>
    %21 = vector.multi_reduction <maximumf>, %16, %cst_12 [1] : vector<64x64xf32> to vector<64xf32>
    %22 = vector.shape_cast %21 : vector<64xf32> to vector<64x1xf32>
    %23 = vector.broadcast %22 : vector<64x1xf32> to vector<64x64xf32>
    %24 = arith.subf %16, %23 : vector<64x64xf32>
    %25 = math.exp %20 : vector<64x64xf32>
    %cst_13 = arith.constant dense<0.000000e+00> : vector<64xf32>
    %26 = vector.multi_reduction <add>, %25, %cst_13 [1] : vector<64x64xf32> to vector<64xf32>
    %27 = vector.shape_cast %26 : vector<64xf32> to vector<64x1xf32>
    %28 = math.exp %24 : vector<64x64xf32>
    %cst_14 = arith.constant dense<0.000000e+00> : vector<64xf32>
    %29 = vector.multi_reduction <add>, %28, %cst_14 [1] : vector<64x64xf32> to vector<64xf32>
    %30 = vector.shape_cast %29 : vector<64xf32> to vector<64x1xf32>
    %31 = arith.subf %24, %20 : vector<64x64xf32>
    %32 = arith.mulf %28, %31 : vector<64x64xf32>
    %cst_15 = arith.constant dense<0.000000e+00> : vector<64xf32>
    %33 = vector.multi_reduction <add>, %32, %cst_15 [1] : vector<64x64xf32> to vector<64xf32>
    %34 = vector.shape_cast %33 : vector<64xf32> to vector<64x1xf32>
    %35 = arith.divf %34, %30 : vector<64x1xf32>
    %36 = math.log %27 : vector<64x1xf32>
    %37 = arith.addf %35, %36 : vector<64x1xf32>
    %38 = math.log %30 : vector<64x1xf32>
    %39 = arith.subf %37, %38 : vector<64x1xf32>
    %c0_16 = arith.constant 0 : index
    %c0_17 = arith.constant 0 : index
    %40 = vector.load %arg8[%c0_16, %c0_17] : memref<1x1xf32, #tpu.memory_space<vmem>>, vector<1x1xf32>
    %41 = vector.shape_cast %39 : vector<64x1xf32> to vector<1x64x1xf32>
    %cst_18 = arith.constant dense<0.000000e+00> : vector<1xf32>
    %42 = vector.multi_reduction <add>, %41, %cst_18 [1, 2] : vector<1x64x1xf32> to vector<1xf32>
    %43 = vector.shape_cast %42 : vector<1xf32> to vector<1x1x1xf32>
    %44 = vector.extract %43[0, 0, 0] : f32 from vector<1x1x1xf32>
    %45 = vector.broadcast %44 : f32 to vector<1x1xf32>
    %cst_19 = arith.constant 1.562500e-02 : f32
    %46 = vector.broadcast %cst_19 : f32 to vector<1x1xf32>
    %47 = arith.mulf %45, %46 : vector<1x1xf32>
    %48 = arith.addf %40, %47 : vector<1x1xf32>
    %c0_20 = arith.constant 0 : index
    %c0_21 = arith.constant 0 : index
    %49 = vector.load %arg8[%c0_20, %c0_21] : memref<1x1xf32, #tpu.memory_space<vmem>>, vector<1x1xf32>
    tpu.vector_store %arg8[%c0_20, %c0_21], %48 {strides = array<i32>} : memref<1x1xf32, #tpu.memory_space<vmem>>, vector<1x1xf32>,
    %c0_i32_22 = arith.constant 0 : i32
    %50 = arith.cmpi eq, %arg2, %c0_i32_22 : i32
    %51 = arith.extui %50 : i1 to i32
    %c0_i32_23 = arith.constant 0 : i32
    %52 = arith.cmpi ne, %51, %c0_i32_23 : i32
    scf.if %52 {
      %c0_24 = arith.constant 0 : index
      %c0_25 = arith.constant 0 : index
      %53 = vector.load %arg8[%c0_24, %c0_25] : memref<1x1xf32, #tpu.memory_space<vmem>>, vector<1x1xf32>
      %54 = vector.shape_cast %53 : vector<1x1xf32> to vector<1x1xf32>
      %55 = vector.broadcast %54 : vector<1x1xf32> to vector<8x128xf32>
      %c0_26 = arith.constant 0 : index
      %c0_27 = arith.constant 0 : index
      %c0_28 = arith.constant 0 : index
      %c0_29 = arith.constant 0 : index
      %56 = vector.load %arg7[%c0_26, %c0_27, %c0_28, %c0_29] : memref<1x1x8x128xf32, #tpu.memory_space<vmem>>, vector<1x1x8x128xf32>
      %57 = vector.shape_cast %56 : vector<1x1x8x128xf32> to vector<8x128xf32>
      %58 = vector.shape_cast %55 : vector<8x128xf32> to vector<1x1x8x128xf32>
      tpu.vector_store %arg7[%c0_26, %c0_27, %c0_28, %c0_29], %58 {strides = array<i32>} : memref<1x1x8x128xf32, #tpu.memory_space<vmem>>, vector<1x1x8x128xf32>,
    } else {
    }
    return
  }
  func.func @transform_0(%arg0: i32, %arg1: i32, %arg2: i32) -> (i32, i32, i32) {
    %c0_i32 = arith.constant 0 : i32
    %c0_i32_0 = arith.constant 0 : i32
    %c0_i32_1 = arith.constant 0 : i32
    return %arg0, %c0_i32, %c0_i32_0 : i32, i32, i32
  }
  func.func @transform_1(%arg0: i32, %arg1: i32, %arg2: i32) -> (i32, i32, i32) {
    %c0_i32 = arith.constant 0 : i32
    %c0_i32_0 = arith.constant 0 : i32
    %c0_i32_1 = arith.constant 0 : i32
    return %arg0, %c0_i32, %c0_i32_0 : i32, i32, i32
  }
  func.func @transform_2(%arg0: i32, %arg1: i32, %arg2: i32) -> (i32, i32, i32) {
    %c0_i32 = arith.constant 0 : i32
    %c0_i32_0 = arith.constant 0 : i32
    %c0_i32_1 = arith.constant 0 : i32
    return %arg1, %c0_i32, %c0_i32_0 : i32, i32, i32
  }
  func.func @transform_3(%arg0: i32, %arg1: i32, %arg2: i32) -> (i32, i32, i32) {
    %c0_i32 = arith.constant 0 : i32
    %c0_i32_0 = arith.constant 0 : i32
    %c0_i32_1 = arith.constant 0 : i32
    return %arg1, %c0_i32, %c0_i32_0 : i32, i32, i32
  }
  func.func @transform_4(%arg0: i32, %arg1: i32, %arg2: i32) -> (i32, i32, i32, i32) {
    %c0_i32 = arith.constant 0 : i32
    %c0_i32_0 = arith.constant 0 : i32
    %c0_i32_1 = arith.constant 0 : i32
    return %arg0, %arg1, %c0_i32, %c0_i32_0 : i32, i32, i32, i32
  }
}

</mosaic_0001>

<bundles_post_ra>
// kernel: tpu_custom_call.1
= control target key start
LH: loop header
LB: loop body
LE: loop exit
PB: predicated region body
PF: predicated region fallthrough
CT: control target
= control target key end

     0   :  { %9 = vsyncpa [#allocation4], 0  ;;  %s1537_s0 = inlined_call_operand.vmem [shape: bf16[2,64,4], index: 0, kind: input, shape index: {}]   ;;  %s1538_s1 = inlined_call_operand.vmem [shape: bf16[2,64,4], index: 1, kind: input, shape index: {}]   ;;  %s1539_s2 = inlined_call_operand.vmem [shape: bf16[2,4,64], index: 2, kind: input, shape index: {}]   ;;  %s1540_s3 = inlined_call_operand.vmem [shape: bf16[2,4,64], index: 3, kind: input, shape index: {}]   ;;  %s1541_s4 = inlined_call_operand.hbm [shape: f32[2,2,8,128], index: 4, kind: output, shape index: {}]  }
   0x1   :  { %11 = vsyncpa [#allocation4 + $0x1], 0  ;;  %s1287_s15 = smov 0   ;;  %s1289_s16 = smov 0  }
   0x2   :  { %s1291_s17 = smov 0   ;;  %s1293_s18 = smov 0  }
   0x3   :  { %s1295_s19 = smov 0   ;;  %s1297_s20 = smov 0  }
   0x4   :  { %s1299_s21 = smov 0   ;;  %s1301_s22 = smov 0  }
   0x5 LB: > { %s930_s23 = sadd.s32 4294967295, %s1257_s22   ;;  %s931_s24 = sadd.s32 4294967294, %s1257_s22   ;;  %s1257_s22 = sphi %s1301_s22, %s17_s22   ;;  %s1253_s21 = sphi %s1299_s21, %s1553_s21   ;;  %s1249_s20 = sphi %s1297_s20, %s1552_s20   ;;  %s1245_s19 = sphi %s1295_s19, %s1551_s19   ;;  %s1241_s18 = sphi %s1293_s18, %s1550_s18   ;;  %s1237_s17 = sphi %s1291_s17, %s1549_s17   ;;  %s1233_s16 = sphi %s1289_s16, %s1548_s16   ;;  %s1229_s15 = sphi %s1287_s15, %s1547_s15  }
   0x6   : > { %s32_s25 = sadd.s32 1, %s1249_s20  ;;  %s36_s26 = sadd.s32 1, %s1253_s21 }
   0x7   : > { %p34_p0 = scmp.ge.s32.totalorder %s32_s25, 2  ;;  %p159_p1 = scmp.ne.s32.totalorder %s1237_s17, %s1233_s16 }
   0x8   : > { %p160_p2 = scmp.eq.s32.totalorder %s930_s23, 3  ;;  %p165_p5 = scmp.ne.s32.totalorder %s1233_s16, %s1229_s15 }
   0x9   : > { %s1555_s25 = smov (%p34_p0, %s32_s25), 0  ;;  %s1557_s26 = smov (!%p34_p0, %s36_s26), %s1253_s21 }
   0xa   : > { %s145_s27 = ssub.s32 %s1249_s20, %s1555_s25  ;;  %p1338_p3 = por %p160_p2, %p159_p1 }
   0xb   : > { %p38_p4 = scmp.ge.s32.totalorder %s1557_s26, 2  ;;  %p166_p6 = scmp.eq.s32.totalorder %s931_s24, 3 }
   0xc   : > { %p934_p7 = scmp.ge.s32.totalorder %s1257_s22, 1  ;;  %p214_p9 = scmp.lt.s32.totalorder %s1257_s22, 5 }
   0xd   : > { %s1559_s26 = smov (%p38_p4, %s1557_s26), 0  ;;  %p1347_p8 = por %p166_p6, %p165_p5 }
   0xe   : > { %1544 = sst [smem:[#allocation6_spill]] %s1559_s26  ;;  %s144_s30 = ssub.s32 %s1253_s21, %s1559_s26 }
   0xf   : > { %s149_s5 = sadd.s32 1, %s1237_s17  ;;  %s146_s6 = sor.u32 %s145_s27, %s144_s30 }
  0x10   : > { %p215_p10 = pnand %p934_p7, %p214_p9  ;;  %p147_p11 = scmp.eq.s32.totalorder %s146_s6, 0 }
  0x11   : > { %p263_p12 = scmp.lt.s32.totalorder (!%p215_p10), %s1241_s18, 1  ;;  %p253_p13 = scmp.lt.s32.totalorder (!%p215_p10), %s1245_s19, 1  ;;  %vm335_vm0 = vcmask (!%p215_p10), 1041408   ;;  %vm322_vm1 = vcmask (!%p215_p10), 31744   ;;  %vm505_vm2 = vcmask (!%p215_p10), 523264   ;;  %vm755_vm3 = vcmask (!%p215_p10), 7168  }
  0x12   : > { %s1356_s7 = scalar_select %p147_p11, %s1237_s17, %s149_s5  }
  0x13   : > { %218 = sbr.rel (%p215_p10) target bundleno = 965 (0x3c5), region = 36  ;;  %vm276_vm4 = vcmask (!%p215_p10), 0   ;;  %s960_s12 = sshll.u32 (!%p215_p10), %s1245_s19, 1 }
  0x1a   : > { %s264_s8 = scalar_select %p263_p12, %s1241_s18, 1 }
  0x1b   : > { %s254_s9 = scalar_select %p253_p13, %s1245_s19, 1 }
  0x1c   : > { %s940_s10 = sshll.u32 %s264_s8, 1 }
  0x1d   : > { %s266_s13 = scalar_lea.vmem %s1539_s2, %s940_s10  ;;  %s270_s24 = scalar_lea.vmem %s1540_s3, %s940_s10 }
  0x1e   : > { %v301_v0 = vld [vmem:[%s266_s13] sm:$0x3]  ;;  %s964_s27 = sshll.u32 %s254_s9, 5  ;;  %s250_s9 = sand.u32 1, %s1233_s16  }
  0x1f   : > { %v404_v1 = vld [vmem:[%s270_s24] sm:$0x3]  ;;  %996 = vmatprep.subr.msk.bf16.mxu0 %vm335_vm0, %v301_v0  ;;  %v337_v2 = vsel %vm335_vm0, %v301_v0, 0  ;;  %s257_s6 = scalar_lea.vmem %s1537_s0, %s964_s27  ;;  %s262_s11 = scalar_lea.vmem %s1538_s1, %s964_s27 }
  0x20   : > { %997 = vmatprep.subr.msk.bf16.mxu1 %vm335_vm0, %v404_v1  ;;  %v438_v3 = vsel %vm335_vm0, %v404_v1, 0  ;;  %977 = vmatpush3.bf16.msra.mxu0 %v337_v2  ;;  %v1075_v4 = vld [vmem:[%s257_s6] sm:$0xff]   ;;  %v1077_v6 = vld [vmem:[%s257_s6 + $0x8] sm:$0xff]   ;;  %v1079_v8 = vld [vmem:[%s257_s6 + $0x10] sm:$0xff]   ;;  %s935_s10 = sshll.u32 %s250_s9, 3  ;;  %s811_s13 = sadd.s32 %s1241_s18, %s960_s12 }
  0x21   : > { %987 = vmatpush3.bf16.msra.mxu1 %v438_v3  ;;  %v1076_v5 = vld [vmem:[%s262_s11] sm:$0xff]   ;;  %978 = vmatprep.mubr.msk.bf16.mxu0 %vm322_vm1, %v1075_v4  ;;  %v1078_v7 = vld [vmem:[%s262_s11 + $0x8] sm:$0xff]   ;;  %v1080_v9 = vld [vmem:[%s262_s11 + $0x10] sm:$0xff]   ;;  %s252_s14 = scalar_lea.vmem [#allocation3], %s935_s10  ;;  %s961_s24 = sshll.u32 %s811_s13, 7 }
  0x22   : > { %988 = vmatprep.mubr.msk.bf16.mxu1 %vm322_vm1, %v1076_v5  ;;  %v1081_v10 = vld [vmem:[%s257_s6 + $0x18] sm:$0xff]   ;;  %s815_s23 = sshll.u32 %s252_s14, 4  ;;  %s1486_s5 = scalar_lea.hbm %s1541_s4, %s961_s24  ;;  %s1481_s23 = int_to_ptr.vmem [resolvable:$true] %s815_s23 }
  0x23   : > { %979 = vmatmul.mubr.msk.bf16.vlgmr.msra.gmra.mrb[0].mxu0 %vm322_vm1, %v1077_v6  ;;  %v1082_v11 = vld [vmem:[%s262_s11 + $0x18] sm:$0xff]   ;;  %s800_s6 = scalar_lea.sflag [#allocation4], %s250_s9  ;;  %s1163_s8 = scalar_lea.vmem %s1481_s23, 128 }
  0x24   : > { %989 = vmatmul.mubr.msk.bf16.vlgmr.msra.gmra.mrb[0].mxu1 %vm322_vm1, %v1078_v7  ;;  %982 = vmatprep.mubr.msk.bf16.mxu0 %vm322_vm1, %v1079_v8  ;;  %p1164_p0 = scmp.ne.s32.totalorder %s1481_s23, %s1163_s8  ;;  %s1261_s18 = smov [#allocation3]  }
  0x25   : > { %992 = vmatprep.mubr.msk.bf16.mxu1 %vm322_vm1, %v1080_v9  ;;  %s1167_s19 = sshll.u32 %s1261_s18, 4  ;;  %s1168_s19 = int_to_ptr.vmem [resolvable:$false] %s1167_s19 }
  0x26   : > { %p1165_p1 = pnand %p1164_p0, %p1338_p3  ;;  %s1169_s11 = scalar_lea.vmem %s1168_s19, 256 }
  0x27   : > { %p1170_p4 = scmp.lt.s32.totalorder %s1481_s23, %s1168_s19  ;;  %p1171_p5 = scmp.lt.s32.totalorder %s1169_s11, %s1163_s8 }
  0x28   : > { %p1166_p2 = pneg %p1165_p1 }
  0x29   : > { %p1172_p6 = por %p1171_p5, %p1170_p4 }
  0x2b   : > { %983 = vmatmul.mubr.msk.bf16.gmra.mrb[4].mxu0 %vm322_vm1, %v1081_v10  ;;  %p1173_p7 = pnand %p1172_p6, %p1166_p2 }
  0x2c   : > { %993 = vmatmul.mubr.msk.bf16.gmra.mrb[4].mxu1 %vm322_vm1, %v1082_v11 }
  0xf6   : > { %v980_v12 = vpop.f32.mrb[0].mxu0 }
  0xf7   : > { %v990_v13 = vpop.f32.mrb[0].mxu1  ;;  %v373_v14 = vpop.f32.mrb[1].mxu0  ;;  %v512_v15 = vsel %vm505_vm2, %v980_v12, -inf }
  0xf8   : > { %v474_v16 = vpop.f32.mrb[1].mxu1  ;;  %v544_v17 = vsel %vm505_vm2, %v990_v13, -inf  ;;  %513 = vmax.xlane.f32.xlu0 %v512_v15  ;;  %v981_v18 = vpop.f32.mrb[2].mxu0  ;;  %v506_v22 = vsel %vm505_vm2, %v373_v14, -inf }
  0xf9   : > { %545 = vmax.xlane.f32.xlu1 %v544_v17  ;;  %v991_v19 = vpop.f32.mrb[2].mxu1  ;;  %v1384_v20 = vpop.f32.mrb[3].mxu0  ;;  %v538_v23 = vsel %vm505_vm2, %v474_v16, -inf  ;;  %v515_v25 = vsel %vm505_vm2, %v981_v18, -inf }
  0xfa   : > { %v1386_v21 = vpop.f32.mrb[3].mxu1  ;;  %v547_v28 = vsel %vm505_vm2, %v991_v19, -inf  ;;  %v509_v34 = vsel %vm505_vm2, %v1384_v20, -inf }
  0xfb   : > { %v541_v35 = vsel %vm505_vm2, %v1386_v21, -inf }
  0xfc   : > { %507 = vmax.xlane.f32.xlu0 %v506_v22 }
  0xfd   : > { %539 = vmax.xlane.f32.xlu1 %v538_v23 }
  0xfe   : > { %v1390_v24 = vpop.f32.mrb[4].mxu0 }
  0xff   : > { %v1393_v26 = vpop.f32.mrb[4].mxu1  ;;  %v1395_v27 = vpop.f32.mrb[5].mxu0  ;;  %v524_v36 = vsel %vm505_vm2, %v1390_v24, -inf }
 0x100   : > { %516 = vmax.xlane.f32.xlu0 %v515_v25  ;;  %v1398_v29 = vpop.f32.mrb[5].mxu1  ;;  %v1400_v30 = vpop.f32.mrb[6].mxu0  ;;  %v556_v37 = vsel %vm505_vm2, %v1393_v26, -inf  ;;  %v518_v38 = vsel %vm505_vm2, %v1395_v27, -inf }
 0x101   : > { %548 = vmax.xlane.f32.xlu1 %v547_v28  ;;  %v1402_v31 = vpop.f32.mrb[7].mxu0  ;;  %v1404_v32 = vpop.f32.mrb[6].mxu1  ;;  %v550_v39 = vsel %vm505_vm2, %v1398_v29, -inf  ;;  %v527_v42 = vsel %vm505_vm2, %v1400_v30, -inf }
 0x102   : > { %v1406_v33 = vpop.f32.mrb[7].mxu1  ;;  %v521_v41 = vsel %vm505_vm2, %v1402_v31, -inf  ;;  %v559_v43 = vsel %vm505_vm2, %v1404_v32, -inf }
 0x103   : > { %v553_v40 = vsel %vm505_vm2, %v1406_v33, -inf }
 0x104   : > { %510 = vmax.xlane.f32.xlu0 %v509_v34 }
 0x105   : > { %542 = vmax.xlane.f32.xlu1 %v541_v35 }
 0x108   : > { %525 = vmax.xlane.f32.xlu0 %v524_v36 }
 0x109   : > { %557 = vmax.xlane.f32.xlu1 %v556_v37 }
 0x10c   : > { %519 = vmax.xlane.f32.xlu0 %v518_v38 }
 0x10d   : > { %551 = vmax.xlane.f32.xlu1 %v550_v39 }
 0x110   : > { %522 = vmax.xlane.f32.xlu0 %v521_v41 }
 0x111   : > { %554 = vmax.xlane.f32.xlu1 %v553_v40 }
 0x114   : > { %528 = vmax.xlane.f32.xlu0 %v527_v42 }
 0x115   : > { %560 = vmax.xlane.f32.xlu1 %v559_v43 }
 0x185   : > { %v514_v44 = vpop.xlane.xlu0 %513 }
 0x186   : > { %v546_v45 = vpop.xlane.xlu1 %545  ;;  %v532_v46 = vsub.f32 %v980_v12, %v514_v44 }
 0x187   : > { %v564_v47 = vsub.f32 %v990_v13, %v546_v45 }
 0x188   : > { %v574_v48 = vmul.f32 1.442695, %v532_v46 }
 0x189   : > { %v614_v49 = vmul.f32 1.442695, %v564_v47  ;;  %v652_v50 = vsub.f32 %v564_v47, %v532_v46  ;;  %v508_v51 = vpop.xlane.xlu0 %507 }
 0x18a   : > { %1083 = vpow2.f32 %v574_v48  ;;  %v540_v52 = vpop.xlane.xlu1 %539  ;;  %v530_v53 = vsub.f32 %v373_v14, %v508_v51 }
 0x18b   : > { %1085 = vpow2.f32 %v614_v49  ;;  %v562_v54 = vsub.f32 %v474_v16, %v540_v52 }
 0x18c   : > { %v570_v55 = vmul.f32 1.442695, %v530_v53 }
 0x18d   : > { %v610_v56 = vmul.f32 1.442695, %v562_v54  ;;  %v650_v57 = vsub.f32 %v562_v54, %v530_v53  ;;  %v517_v58 = vpop.xlane.xlu0 %516 }
 0x18e   : > { %1087 = vpow2.f32 %v570_v55  ;;  %v549_v59 = vpop.xlane.xlu1 %548  ;;  %v533_v60 = vsub.f32 %v981_v18, %v517_v58 }
 0x18f   : > { %1089 = vpow2.f32 %v610_v56  ;;  %v565_v61 = vsub.f32 %v991_v19, %v549_v59 }
 0x190   : > { %v576_v62 = vmul.f32 1.442695, %v533_v60 }
 0x191   : > { %v616_v63 = vmul.f32 1.442695, %v565_v61  ;;  %v653_v0 = vsub.f32 %v565_v61, %v533_v60  ;;  %v511_v1 = vpop.xlane.xlu0 %510 }
 0x192   : > { %v543_v2 = vpop.xlane.xlu1 %542  ;;  %v531_v3 = vsub.f32 %v1384_v20, %v511_v1 }
 0x193   : > { %1091 = vpow2.f32 %v616_v63  ;;  %v563_v4 = vsub.f32 %v1386_v21, %v543_v2 }
 0x194   : > { %v1084_v5 = vpop.eup %1083  ;;  %1093 = vpow2.f32 %v576_v62  ;;  %v572_v6 = vmul.f32 1.442695, %v531_v3 }
 0x195   : > { %v1086_v7 = vpop.eup %1085  ;;  %v612_v8 = vmul.f32 1.442695, %v563_v4  ;;  %v651_v9 = vsub.f32 %v563_v4, %v531_v3  ;;  %v526_v10 = vpop.xlane.xlu0 %525  ;;  %v592_v11 = vsel %vm505_vm2, %v1084_v5, 0.0 }
 0x196   : > { %1095 = vpow2.f32 %v572_v6  ;;  %v558_v12 = vpop.xlane.xlu1 %557  ;;  %v536_v13 = vsub.f32 %v1390_v24, %v526_v10  ;;  %v632_v14 = vsel %vm505_vm2, %v1086_v7, 0.0  ;;  %593 = vadd.xlane.f32.xlu0 %v592_v11  ;;  %v1433_v15 = vmul.f32 %v1086_v7, %v652_v50 }
 0x197   : > { %1097 = vpow2.f32 %v612_v8  ;;  %v568_v16 = vsub.f32 %v1393_v26, %v558_v12  ;;  %633 = vadd.xlane.f32.xlu1 %v632_v14 }
 0x198   : > { %v1088_v17 = vpop.eup %1087  ;;  %v582_v18 = vmul.f32 1.442695, %v536_v13 }
 0x199   : > { %v1090_v19 = vpop.eup %1089  ;;  %v622_v20 = vmul.f32 1.442695, %v568_v16  ;;  %v656_v21 = vsub.f32 %v568_v16, %v536_v13  ;;  %v520_v22 = vpop.xlane.xlu0 %519  ;;  %v586_v23 = vsel %vm505_vm2, %v1088_v17, 0.0  ;;  %v672_v13 = vsel %vm505_vm2, %v1433_v15, 0.0 }
 0x19a   : > { %v552_v25 = vpop.xlane.xlu1 %551  ;;  %v534_v24 = vsub.f32 %v1395_v27, %v520_v22  ;;  %587 = vadd.xlane.f32.xlu0 %v586_v23  ;;  %v658_v28 = vmul.f32 %v1090_v19, %v650_v57  ;;  %v626_v39 = vsel %vm505_vm2, %v1090_v19, 0.0 }
 0x19b   : > { %1099 = vpow2.f32 %v622_v20  ;;  %v566_v34 = vsub.f32 %v1398_v29, %v552_v25 }
 0x19c   : > { %1101 = vpow2.f32 %v582_v18  ;;  %v578_v35 = vmul.f32 1.442695, %v534_v24  ;;  %v666_v58 = vsel %vm505_vm2, %v658_v28, 0.0 }
 0x19d   : > { %v1092_v26 = vpop.eup %1091  ;;  %v618_v36 = vmul.f32 1.442695, %v566_v34  ;;  %v654_v37 = vsub.f32 %v566_v34, %v534_v24  ;;  %v523_v38 = vpop.xlane.xlu0 %522 }
 0x19e   : > { %v1094_v40 = vpop.eup %1093  ;;  %v555_v41 = vpop.xlane.xlu1 %554  ;;  %v535_v42 = vsub.f32 %v1402_v31, %v523_v38  ;;  %v635_v43 = vsel %vm505_vm2, %v1092_v26, 0.0  ;;  %627 = vadd.xlane.f32.xlu0 %v626_v39  ;;  %v1442_v27 = vmul.f32 %v1092_v26, %v653_v0 }
 0x19f   : > { %1103 = vpow2.f32 %v618_v36  ;;  %v567_v29 = vsub.f32 %v1406_v33, %v555_v41  ;;  %636 = vadd.xlane.f32.xlu1 %v635_v43  ;;  %v595_v31 = vsel %vm505_vm2, %v1094_v40, 0.0 }
 0x1a0   : > { %v1096_v44 = vpop.eup %1095  ;;  %1105 = vpow2.f32 %v578_v35  ;;  %v580_v45 = vmul.f32 1.442695, %v535_v42  ;;  %v675_v17 = vsel %vm505_vm2, %v1442_v27, 0.0 }
 0x1a1   : > { %v1098_v46 = vpop.eup %1097  ;;  %v620_v47 = vmul.f32 1.442695, %v567_v29  ;;  %v655_v48 = vsub.f32 %v567_v29, %v535_v42  ;;  %v529_v49 = vpop.xlane.xlu0 %528  ;;  %v589_v50 = vsel %vm505_vm2, %v1096_v44, 0.0 }
 0x1a2   : > { %v561_v51 = vpop.xlane.xlu1 %560  ;;  %v537_v52 = vsub.f32 %v1400_v30, %v529_v49  ;;  %596 = vadd.xlane.f32.xlu0 %v595_v31  ;;  %v659_v53 = vmul.f32 %v1098_v46, %v651_v9  ;;  %v629_v60 = vsel %vm505_vm2, %v1098_v46, 0.0 }
 0x1a3   : > { %1107 = vpow2.f32 %v620_v47  ;;  %v569_v33 = vsub.f32 %v1404_v32, %v561_v51  ;;  %590 = vadd.xlane.f32.xlu1 %v589_v50 }
 0x1a4   : > { %1109 = vpow2.f32 %v580_v45  ;;  %v584_v54 = vmul.f32 1.442695, %v537_v52  ;;  %v669_v63 = vsel %vm505_vm2, %v659_v53, 0.0 }
 0x1a5   : > { %v1100_v55 = vpop.eup %1099  ;;  %v624_v56 = vmul.f32 1.442695, %v569_v33  ;;  %v657_v57 = vsub.f32 %v569_v33, %v537_v52 }
 0x1a6   : > { %v1102_v59 = vpop.eup %1101  ;;  %667 = vadd.xlane.f32.xlu0 %v666_v58  ;;  %v664_v61 = vmul.f32 %v1100_v55, %v656_v21  ;;  %v644_v4 = vsel %vm505_vm2, %v1100_v55, 0.0 }
 0x1a7   : > { %1111 = vpow2.f32 %v624_v56  ;;  %630 = vadd.xlane.f32.xlu1 %v629_v60  ;;  %v604_v62 = vsel %vm505_vm2, %v1102_v59, 0.0 }
 0x1a8   : > { %1113 = vpow2.f32 %v584_v54  ;;  %v684_v18 = vsel %vm505_vm2, %v664_v61, 0.0 }
 0x1a9   : > { %v1104_v30 = vpop.eup %1103 }
 0x1aa   : > { %v1106_v32 = vpop.eup %1105  ;;  %605 = vadd.xlane.f32.xlu0 %v604_v62  ;;  %v662_v0 = vmul.f32 %v1104_v30, %v654_v37  ;;  %v638_v9 = vsel %vm505_vm2, %v1104_v30, 0.0 }
 0x1ab   : > { %670 = vadd.xlane.f32.xlu1 %v669_v63  ;;  %v598_v2 = vsel %vm505_vm2, %v1106_v32, 0.0 }
 0x1ac   : > { %v678_v16 = vsel %vm505_vm2, %v662_v0, 0.0 }
 0x1ad   : > { %v1108_v1 = vpop.eup %1107 }
 0x1ae   : > { %v1110_v3 = vpop.eup %1109  ;;  %599 = vadd.xlane.f32.xlu0 %v598_v2  ;;  %v663_v5 = vmul.f32 %v1108_v1, %v655_v48  ;;  %v641_v12 = vsel %vm505_vm2, %v1108_v1, 0.0 }
 0x1af   : > { %645 = vadd.xlane.f32.xlu1 %v644_v4  ;;  %v601_v7 = vsel %vm505_vm2, %v1110_v3, 0.0 }
 0x1b0   : > { %v681_v19 = vsel %vm505_vm2, %v663_v5, 0.0 }
 0x1b1   : > { %v1112_v6 = vpop.eup %1111 }
 0x1b2   : > { %v1114_v8 = vpop.eup %1113  ;;  %602 = vadd.xlane.f32.xlu0 %v601_v7  ;;  %v665_v10 = vmul.f32 %v1112_v6, %v657_v57  ;;  %v647_v14 = vsel %vm505_vm2, %v1112_v6, 0.0 }
 0x1b3   : > { %639 = vadd.xlane.f32.xlu1 %v638_v9  ;;  %v607_v11 = vsel %vm505_vm2, %v1114_v8, 0.0 }
 0x1b4   : > { %v687_v20 = vsel %vm505_vm2, %v665_v10, 0.0 }
 0x1b6   : > { %608 = vadd.xlane.f32.xlu0 %v607_v11 }
 0x1b7   : > { %642 = vadd.xlane.f32.xlu1 %v641_v12 }
 0x1ba   : > { %673 = vadd.xlane.f32.xlu0 %v672_v13 }
 0x1bb   : > { %648 = vadd.xlane.f32.xlu1 %v647_v14 }
 0x1be   : > { %679 = vadd.xlane.f32.xlu0 %v678_v16 }
 0x1bf   : > { %676 = vadd.xlane.f32.xlu1 %v675_v17 }
 0x1c2   : > { %685 = vadd.xlane.f32.xlu0 %v684_v18 }
 0x1c3   : > { %682 = vadd.xlane.f32.xlu1 %v681_v19 }
 0x1c7   : > { %688 = vadd.xlane.f32.xlu1 %v687_v20 }
 0x223   : > { %v594_v15 = vpop.xlane.xlu0 %593 }
 0x224   : > { %v634_v22 = vpop.xlane.xlu1 %633  ;;  %1115 = vlog2.f32 %v594_v15 }
 0x225   : > { %1117 = vrcp.f32 %v634_v22 }
 0x227   : > { %v588_v21 = vpop.xlane.xlu0 %587 }
 0x22b   : > { %v628_v23 = vpop.xlane.xlu0 %627 }
 0x22c   : > { %v637_v25 = vpop.xlane.xlu1 %636  ;;  %1119 = vrcp.f32 %v628_v23 }
 0x22e   : > { %v1116_v38 = vpop.eup %1115 }
 0x22f   : > { %v597_v24 = vpop.xlane.xlu0 %596  ;;  %v1118_v40 = vpop.eup %1117  ;;  %v711_v60 = vmul.f32 0.6931472, %v1116_v38 }
 0x230   : > { %v591_v28 = vpop.xlane.xlu1 %590 }
 0x233   : > { %v668_v34 = vpop.xlane.xlu0 %667 }
 0x234   : > { %v631_v35 = vpop.xlane.xlu1 %630 }
 0x235   : > { %1121 = vrcp.f32 %v631_v35 }
 0x236   : > { %1123 = vlog2.f32 %v591_v28  ;;  %v1120_v41 = vpop.eup %1119 }
 0x237   : > { %1125 = vlog2.f32 %v634_v22  ;;  %v606_v26 = vpop.xlane.xlu0 %605  ;;  %v691_v49 = vmul.f32 %v1120_v41, %v668_v34 }
 0x238   : > { %1127 = vlog2.f32 %v588_v21  ;;  %v671_v36 = vpop.xlane.xlu1 %670 }
 0x239   : > { %1129 = vrcp.f32 %v637_v25 }
 0x23a   : > { %1131 = vlog2.f32 %v631_v35 }
 0x23b   : > { %1133 = vlog2.f32 %v637_v25  ;;  %v600_v37 = vpop.xlane.xlu0 %599 }
 0x23c   : > { %1135 = vlog2.f32 %v628_v23  ;;  %v646_v39 = vpop.xlane.xlu1 %645 }
 0x23d   : > { %1137 = vlog2.f32 %v597_v24 }
 0x23e   : > { %1139 = vlog2.f32 %v606_v26 }
 0x23f   : > { %v1122_v42 = vpop.eup %1121  ;;  %1141 = vlog2.f32 %v600_v37  ;;  %v603_v43 = vpop.xlane.xlu0 %602 }
 0x240   : > { %v1124_v27 = vpop.eup %1123  ;;  %1143 = vrcp.f32 %v646_v39  ;;  %v640_v29 = vpop.xlane.xlu1 %639  ;;  %v693_v45 = vmul.f32 %v1122_v42, %v671_v36 }
 0x241   : > { %v1126_v44 = vpop.eup %1125  ;;  %1145 = vrcp.f32 %v640_v29  ;;  %v709_v48 = vmul.f32 0.6931472, %v1124_v27 }
 0x242   : > { %v1128_v46 = vpop.eup %1127  ;;  %1147 = vlog2.f32 %v640_v29  ;;  %v735_v1 = vmul.f32 0.6931472, %v1126_v44 }
 0x243   : > { %v1130_v47 = vpop.eup %1129  ;;  %1149 = vlog2.f32 %v646_v39  ;;  %v609_v50 = vpop.xlane.xlu0 %608  ;;  %v707_v53 = vmul.f32 0.6931472, %v1128_v46  ;;  %v723_v33 = vadd.f32 %v709_v48, %v693_v45 }
 0x244   : > { %v1132_v31 = vpop.eup %1131  ;;  %1151 = vlog2.f32 %v603_v43  ;;  %v643_v51 = vpop.xlane.xlu1 %642 }
 0x245   : > { %v1134_v52 = vpop.eup %1133  ;;  %1153 = vrcp.f32 %v643_v51  ;;  %v733_v56 = vmul.f32 0.6931472, %v1132_v31  ;;  %v722_v57 = vadd.f32 %v707_v53, %v691_v49 }
 0x246   : > { %v1136_v54 = vpop.eup %1135  ;;  %1155 = vlog2.f32 %v643_v51  ;;  %v737_v17 = vmul.f32 0.6931472, %v1134_v52 }
 0x247   : > { %v1138_v55 = vpop.eup %1137  ;;  %1157 = vlog2.f32 %v609_v50  ;;  %v674_v58 = vpop.xlane.xlu0 %673  ;;  %v731_v32 = vmul.f32 0.6931472, %v1136_v54  ;;  %v747_v63 = vsub.f32 %v723_v33, %v733_v56 }
 0x248   : > { %v1140_v59 = vpop.eup %1139  ;;  %v649_v61 = vpop.xlane.xlu1 %648  ;;  %v695_v30 = vmul.f32 %v1118_v40, %v674_v58  ;;  %v713_v12 = vmul.f32 0.6931472, %v1138_v55 }
 0x249   : > { %v1142_v62 = vpop.eup %1141  ;;  %1159 = vrcp.f32 %v649_v61  ;;  %v746_v4 = vsub.f32 %v722_v57, %v731_v32  ;;  %v757_v13 = vsel %vm755_vm3, %v747_v63, 0.0  ;;  %v719_v28 = vmul.f32 0.6931472, %v1140_v59 }
 0x24a   : > { %v1144_v0 = vpop.eup %1143  ;;  %1161 = vlog2.f32 %v649_v61  ;;  %v724_v2 = vadd.f32 %v711_v60, %v695_v30  ;;  %v715_v7 = vmul.f32 0.6931472, %v1142_v62  ;;  %v1259_v61 = vmov 0.0  }
 0x24b   : > { %v1146_v3 = vpop.eup %1145  ;;  %v680_v5 = vpop.xlane.xlu0 %679  ;;  %v756_v20 = vsel %vm755_vm3, %v746_v4, 0.0  ;;  %277 = vst.msk [vmem:[#allocation2] sm:$0x1] %vm276_vm4, %v1259_v61  ;;  %v1260_v30 = vmov 0  }
 0x24c   : > { %v1148_v6 = vpop.eup %1147  ;;  %v748_v8 = vsub.f32 %v724_v2, %v735_v1  ;;  %v677_v9 = vpop.xlane.xlu1 %676  ;;  %v699_v10 = vmul.f32 %v1146_v3, %v680_v5  ;;  %v758_v24 = vadd.f32 %v757_v13, %v756_v20  ;;  %1073 = vset.pattern.permute.xlu1 %v1260_v30  ;;  %1074 = vset.pattern.permute.xlu0 %v1260_v30 }
 0x24d   : > { %v1150_v11 = vpop.eup %1149  ;;  %v697_v14 = vmul.f32 %v1130_v47, %v677_v9  ;;  %v739_v15 = vmul.f32 0.6931472, %v1148_v6 }
 0x24e   : > { %v1152_v16 = vpop.eup %1151  ;;  %v726_v18 = vadd.f32 %v715_v7, %v699_v10  ;;  %v759_v21 = vsel %vm755_vm3, %v748_v8, 0.0  ;;  %v743_v43 = vmul.f32 0.6931472, %v1150_v11 }
 0x24f   : > { %v1154_v19 = vpop.eup %1153  ;;  %v725_v22 = vadd.f32 %v713_v12, %v697_v14  ;;  %v686_v23 = vpop.xlane.xlu0 %685  ;;  %v717_v36 = vmul.f32 0.6931472, %v1152_v16  ;;  %v760_v40 = vadd.f32 %v759_v21, %v758_v24 }
 0x250   : > { %v1156_v25 = vpop.eup %1155  ;;  %v683_v34 = vpop.xlane.xlu1 %682  ;;  %v703_v35 = vmul.f32 %v1144_v0, %v686_v23  ;;  %v750_v38 = vsub.f32 %v726_v18, %v739_v15 }
 0x251   : > { %v1158_v26 = vpop.eup %1157  ;;  %v749_v37 = vsub.f32 %v725_v22, %v737_v17  ;;  %v701_v39 = vmul.f32 %v1154_v19, %v683_v34  ;;  %v741_v27 = vmul.f32 0.6931472, %v1156_v25 }
 0x252   : > { %v728_v41 = vadd.f32 %v719_v28, %v703_v35  ;;  %v721_v46 = vmul.f32 0.6931472, %v1158_v26  ;;  %v763_v49 = vsel %vm755_vm3, %v750_v38, 0.0  ;;  %v754_v4 = vld [vmem:[#allocation2] sm:$0x1] }
 0x253   : > { %v1160_v42 = vpop.eup %1159  ;;  %v761_v29 = vsel %vm755_vm3, %v749_v37, 0.0  ;;  %v727_v44 = vadd.f32 %v717_v36, %v701_v39 }
 0x254   : > { %v1162_v45 = vpop.eup %1161  ;;  %v762_v47 = vadd.f32 %v761_v29, %v760_v40  ;;  %v689_v48 = vpop.xlane.xlu1 %688  ;;  %v752_v31 = vsub.f32 %v728_v41, %v743_v43 }
 0x255   : > { %v751_v50 = vsub.f32 %v727_v44, %v741_v27  ;;  %v705_v51 = vmul.f32 %v1160_v42, %v689_v48  ;;  %v745_v53 = vmul.f32 0.6931472, %v1162_v45 }
 0x256   : > { %v764_v52 = vadd.f32 %v763_v49, %v762_v47  ;;  %v767_v57 = vsel %vm755_vm3, %v752_v31, 0.0 }
 0x257   : > { %v729_v33 = vadd.f32 %v721_v46, %v705_v51  ;;  %v765_v54 = vsel %vm755_vm3, %v751_v50, 0.0 }
 0x258   : > { %v766_v55 = vadd.f32 %v765_v54, %v764_v52 }
 0x259   : > { %v753_v56 = vsub.f32 %v729_v33, %v745_v53 }
 0x25a   : > { %v768_v58 = vadd.f32 %v767_v57, %v766_v55 }
 0x25b   : > { %v769_v59 = vsel %vm755_vm3, %v753_v56, 0.0 }
 0x25c   : > { %v770_v60 = vadd.f32 %v769_v59, %v768_v58 }
 0x25e   : > { %771 = vadd.xlane.f32.xlu0 %v770_v60 }
 0x2eb   : > { %v772_v62 = vpop.xlane.xlu0 %771 }
 0x2ec   : > { %v773_v32 = vrot.slane %v772_v62, 4 }
 0x2ee   : > { %v774_v63 = vadd.f32 %v773_v32, %v772_v62 }
 0x2f0   : > { %v775_v0 = vrot.slane %v774_v63, 2 }
 0x2f2   : > { %v776_v1 = vadd.f32 %v775_v0, %v774_v63 }
 0x2f4   : > { %v777_v2 = vrot.slane %v776_v1, 1 }
 0x2f6   : > { %v778_v3 = vadd.f32 %v777_v2, %v776_v1 }
 0x2f8   : > { %998 = vpush %v778_v3 }
 0x329   : > { %s999_s26 = spop %998 }
 0x32a   : > { %v780_v5 = vstv %s999_s26 }
 0x32b   : > { %v781_v6 = vmul.f32 0.015625, %v780_v5 }
 0x32d   : > { %v782_v7 = vadd.f32 %v781_v6, %v754_v4 }
 0x32f   : > { %784 = vst.msk [vmem:[#allocation2] sm:$0x1] %vm276_vm4, %v782_v7 }
 0x336   : > { %v958_v8 = vld [vmem:[#allocation2] ss:$0 sm:$0xff] }
 0x337   : > { %795 = vperm.xlu1 %1073, %v958_v8  }
 0x3b6   : > { %v796_v9 = vpop.permute.xlu1 %795 }
 0x3b7   : > { %798 = vst [vmem:[%s252_s14] sm:$0xff] %v796_v9 }
 0x3b8   : > { %1176 = shalt.err (!%p1173_p7)
}
 0x3b9   : > { %s1177_s26 = scalar_lea.hbm %s1486_s5, 128  ;;  %s1181_s12 = scalar_lea.hbm %s1541_s4, 512 }
 0x3ba   : > { %p1178_p9 = scmp.ne.s32.totalorder %s1486_s5, %s1177_s26  ;;  %p1182_p12 = scmp.lt.u32.totalorder %s1486_s5, %s1541_s4 }
 0x3bb   : > { %p1183_p13 = scmp.lt.u32.totalorder %s1181_s12, %s1177_s26  ;;  %p1185_p1 = scmp.lt.u32.totalorder %s1177_s26, %s1486_s5 }
 0x3bc   : > { %p1179_p10 = pnand %p1178_p9, %p1338_p3 }
 0x3bd   : > { %p1184_p0 = por %p1183_p13, %p1182_p12 }
 0x3be   : > { %p1180_p11 = pneg %p1179_p10 }
 0x3bf   : > { %p1186_p2 = por %p1185_p1, %p1184_p0 }
 0x3c1   : > { %p1187_p4 = pnand %p1186_p2, %p1180_p11 }
 0x3c3   : > { %1190 = shalt.err (!%p1187_p4)
}
 0x3c4   : > { %1000 = dma.vmem_to_hbm [thread:$0]  (%p1338_p3), %s1481_s23, 128, %s1486_s5, %s800_s6  }
 0x3c5 PF: > { %p1006_p5 = scmp.ge.s32.totalorder %s1257_s22, 2  ;;  %s827_s24 = sand.u32 1, %s1229_s15  }
 0x3c6   : > { %s828_s27 = scalar_lea.sflag [#allocation4], %s827_s24 }
 0x3c7   : > { %p1003_p6 = pnand %p1006_p5, %p1347_p8 }
 0x3c9   : > { %1224 = dma.done.wait (!%p1003_p6), %s828_s27, 128  }
 0x3ca   : > { %1226 = vsyncadd (!%p1003_p6), %s828_s27, 4294967168  ;;  %s17_s22 = sadd.s32 1, %s1257_s22   ;;  %s1546_s28 = sld [smem:[#allocation6_spill]] }
 0x3cb   : > { %p14_p7 = scmp.ge.s32.totalorder %s17_s22, 6   ;;  %s1547_s15 = smov %s1233_s16 }
 0x3cc   : > { %s1548_s16 = smov %s1237_s17  ;;  %s1549_s17 = smov %s1356_s7 }
 0x3cd   : > { %s1550_s18 = smov %s1249_s20  ;;  %s1551_s19 = smov %s1253_s21 }
 0x3ce   : > { %s1552_s20 = smov %s1555_s25  ;;  %16 = sbr.rel (!%p14_p7) target bundleno = 5 (0x5), region = 90 }
 0x3d0   : > { %s1553_s21 = smov %s1546_s28 }
 0x3d5   :  { %833 = vsyncpa [#allocation4], 1 }
 0x3d6   :  { %835 = vsyncpa [#allocation4 + $0x1], 1 }

</bundles_post_ra>
